<compile_context>
chip_gen: v7x
topology: tpu7x:2x2x1
jax: 0.10.0
libtpu: 0.0.40
codegen_flags: <defaults>
</compile_context>

<pallas_src>
import functools

import jax
import jax.numpy as jnp
from jax import lax
from jax.experimental import pallas as pl
from jax.experimental.pallas import tpu as pltpu


def _round_up(v, m):
    return ((v + m - 1) // m) * m


def _vmem_limit_bytes():
    """Pick a per-kernel scoped-VMEM limit from the hardware (with fallback)."""
    cap = 64 * 1024 * 1024  # conservative fallback (v7x physical VMEM per TC)
    try:
        info = pltpu.get_tpu_info()
        cap = int(getattr(info, "vmem_capacity_bytes", cap))
    except Exception:
        pass
    # Leave headroom below physical capacity; cap at ~100 MiB as recommended.
    return int(min((cap * 3) // 4, 100 * 1024 * 1024))


def _dot_attn_agg_kernel(x_ref, y_ref,
                         wk_ref, bk_ref,
                         wq_ref, bq_ref,
                         wv_ref, bv_ref,
                         w_ref, b_ref,
                         out_ref,
                         ws_sc, bs_sc, csum_sc, add_sc,
                         *, n_rows, m_rows, tile_n):
    phase = pl.program_id(0)     # 0: accumulate column-sum, 1: write output
    i = pl.program_id(1)         # N-tile index

    x = x_ref[...]                                           # (tile_n, Dx)

    # ---- once per launch: fuse the k-projection into the score weights -----
    #   s = (x @ wk + bk) @ q.T = x @ (wk @ q.T) + (bk @ q.T)
    @pl.when(jnp.logical_and(phase == 0, i == 0))
    def _():
        # q = linear_q(y); only a short-lived intermediate (Mosaic temp).
        q = (jnp.dot(y_ref[...], wq_ref[...],
                     preferred_element_type=jnp.float32)
             + bq_ref[...].astype(jnp.float32))              # (Mp, Hp) f32
        ws_sc[...] = lax.dot_general(
            wk_ref[...].astype(jnp.float32), q,
            (((1,), (1,)), ((), ())),
            preferred_element_type=jnp.float32)              # (Dx, Mp)
        m_pad = bs_sc.shape[-1]
        col = lax.broadcasted_iota(jnp.int32, (1, m_pad), 1)
        col_mask = jnp.where(col < m_rows, 0.0, -1e30).astype(jnp.float32)
        bs_sc[...] = (lax.dot_general(
            bk_ref[...].astype(jnp.float32), q,
            (((1,), (1,)), ((), ())),
            preferred_element_type=jnp.float32)
            + col_mask)                                      # (1, Mp), pad -> -1e30
        csum_sc[...] = jnp.zeros_like(csum_sc)

    # ---- phase 0: accumulate column-sum of the softmax attention -----------
    @pl.when(phase == 0)
    def _():
        s = (jnp.dot(x, ws_sc[...], preferred_element_type=jnp.float32)
             + bs_sc[...])                                   # (tile_n, Mp)
        s = s - jnp.max(s, axis=-1, keepdims=True)
        p = jnp.exp(s)
        denom = jnp.sum(p, axis=-1, keepdims=True)
        r = pl.reciprocal(denom, approx=True)                # EUP slot
        r = r * (2.0 - denom * r)                            # one Newton step
        a = p * r                                            # exact softmax

        # Masked ones-row @ a: fuses the row-padding mask with the axis-0
        # reduction and keeps it on the MXU.
        row = i * tile_n + lax.broadcasted_iota(jnp.int32, (1, tile_n), 1)
        ones = (row < n_rows).astype(jnp.float32)            # (1, tile_n)
        csum_sc[...] += jnp.dot(ones, a, preferred_element_type=jnp.float32)

    # ---- phase 1, first step: finalize v and fold in the output bias -------
    @pl.when(jnp.logical_and(phase == 1, i == 0))
    def _():
        agg = jnp.dot(csum_sc[...], y_ref[...].astype(jnp.float32),
                      preferred_element_type=jnp.float32)    # (1, Dy)
        v = (jnp.dot(agg, wv_ref[...].astype(jnp.float32),
                     preferred_element_type=jnp.float32)
             + float(n_rows) * bv_ref[...].astype(jnp.float32))   # (1, Dp)
        add_sc[...] = v + b_ref[...].astype(jnp.float32)

    # ---- phase 1: stream out = x @ w + (b + v) directly (lane-dense) -------
    @pl.when(phase == 1)
    def _():
        out_ref[...] = (jnp.dot(x, w_ref[...],
                                preferred_element_type=jnp.float32)
                        + add_sc[...]).astype(out_ref.dtype)


def dot_attention_aggregation(x, y, params, *, tile_n=512):
    """x: (N, Dx), y: (M, Dy).  params: weights (in, out) / biases (1, out)."""
    N, Dx = x.shape
    M, Dy = y.shape
    H = params["wk"].shape[1]
    Dout = params["w"].shape[1]

    # Lane-dense padded widths (zero / -inf-masked padding is inert).
    Hp = _round_up(H, 128)
    Dp = _round_up(Dout, 128)
    Mp = _round_up(M, 128)

    itemsize = jnp.dtype(x.dtype).itemsize
    pack = {1: 32, 2: 16}.get(itemsize, 8)   # sublane packing per input dtype

    # --- VMEM-budget-aware N tile -------------------------------------------
    vmem_limit = _vmem_limit_bytes()
    # Residents are double-buffered by the pipeline (block index never changes,
    # so only VMEM is paid, not bandwidth).
    resident = 2 * itemsize * (Mp * Dy                       # y
                               + Dx * Hp + Hp                # wk, bk
                               + Dy * Hp + Hp                # wq, bq
                               + Dy * Dp + Dp                # wv, bv
                               + Dx * Dp + Dp)               # w, b
    scratch = 4 * (Dx * Mp + 2 * Mp + Dp)                    # ws, bs, csum, add
    headroom = 4 * 1024 * 1024
    budget = vmem_limit - resident - scratch - headroom
    # Per-row streamed bytes: x tile + out tile (double-buffered) + f32
    # score/softmax intermediates (~2 live copies of a (., Mp) row).
    per_row = 2 * itemsize * (Dx + Dp) + 2 * 4 * Mp
    max_rows = budget // per_row if budget > 0 else pack
    tile = min(tile_n, _round_up(N, pack), max(pack, (max_rows // pack) * pack))
    tile = max(pack, (tile // pack) * pack)

    n_pad = _round_up(N, tile)
    n_tiles = n_pad // tile

    def pad2(a, r, c):
        a = jnp.asarray(a)
        return jnp.pad(a, ((0, r - a.shape[0]), (0, c - a.shape[1])))

    x_p = pad2(x, n_pad, Dx)
    y_p = pad2(y, Mp, Dy)
    wk = pad2(params["wk"], Dx, Hp); bk = pad2(params["bk"], 1, Hp)
    wq = pad2(params["wq"], Dy, Hp); bq = pad2(params["bq"], 1, Hp)
    wv = pad2(params["wv"], Dy, Dp); bv = pad2(params["bv"], 1, Dp)
    w = pad2(params["w"], Dx, Dp);  b = pad2(params["b"], 1, Dp)

    def resident_spec(shape):
        return pl.BlockSpec(shape, lambda p, i: (0, 0))

    kernel = functools.partial(_dot_attn_agg_kernel,
                               n_rows=N, m_rows=M, tile_n=tile)

    out = pl.pallas_call(
        kernel,
        out_shape=jax.ShapeDtypeStruct((n_pad, Dp), x.dtype),
        grid_spec=pltpu.PrefetchScalarGridSpec(
            num_scalar_prefetch=0,
            grid=(2, n_tiles),                                # (phase, N-tile)
            in_specs=[
                pl.BlockSpec((tile, Dx), lambda p, i: (i, 0)),  # x, streamed twice
                resident_spec((Mp, Dy)),                        # y
                resident_spec((Dx, Hp)), resident_spec((1, Hp)),  # wk, bk
                resident_spec((Dy, Hp)), resident_spec((1, Hp)),  # wq, bq
                resident_spec((Dy, Dp)), resident_spec((1, Dp)),  # wv, bv
                resident_spec((Dx, Dp)), resident_spec((1, Dp)),  # w, b
            ],
            # Phase 0 parks the output on block 0 (never written -> never
            # flushed); phase 1 walks the tiles and writes them.
            out_specs=pl.BlockSpec((tile, Dp), lambda p, i: (i * p, 0)),
            scratch_shapes=[
                pltpu.VMEM((Dx, Mp), jnp.float32),   # Ws = wk @ q.T
                pltpu.VMEM((1, Mp), jnp.float32),    # bs = bk @ q.T + col mask
                pltpu.VMEM((1, Mp), jnp.float32),    # running column-sum of a
                pltpu.VMEM((1, Dp), jnp.float32),    # b + v_sum
            ]),
        compiler_params=pltpu.CompilerParams(
            # Both axes carry the cross-tile reduction ordering -> "arbitrary".
            dimension_semantics=("arbitrary", "arbitrary"),
            vmem_limit_bytes=vmem_limit),
    )(x_p, y_p, wk, bk, wq, bq, wv, bv, w, b)

    return out[:N, :Dout]


def _reference(x, y, params):
    k = x @ params["wk"] + params["bk"]
    q = y @ params["wq"] + params["bq"]
    a = jax.nn.softmax(k @ q.T, axis=-1)
    yy = a @ y
    v = (yy @ params["wv"] + params["bv"]).sum(-2, keepdims=True)
    return x @ params["w"] + params["b"] + v


if __name__ == "__main__":
    # Small shapes consistent with the module's forward:
    N, M = 8, 8          # rows of x, rows of y
    Dx, Dy = 16, 16      # feature dims of x, y
    H = 32               # shared k/q projection dim
    Dout = 32            # output dim of linear_v and linear

    key = jax.random.PRNGKey(0)
    ks = jax.random.split(key, 10)

    x = jax.random.normal(ks[0], (N, Dx), dtype=jnp.float32)
    y = jax.random.normal(ks[1], (M, Dy), dtype=jnp.float32)

    params = {
        "wk": jax.random.normal(ks[2], (Dx, H), dtype=jnp.float32) * 0.1,
        "bk": jax.random.normal(ks[3], (1, H), dtype=jnp.float32) * 0.1,
        "wq": jax.random.normal(ks[4], (Dy, H), dtype=jnp.float32) * 0.1,
        "bq": jax.random.normal(ks[5], (1, H), dtype=jnp.float32) * 0.1,
        "wv": jax.random.normal(ks[6], (Dy, Dout), dtype=jnp.float32) * 0.1,
        "bv": jax.random.normal(ks[7], (1, Dout), dtype=jnp.float32) * 0.1,
        "w":  jax.random.normal(ks[8], (Dx, Dout), dtype=jnp.float32) * 0.1,
        "b":  jax.random.normal(ks[9], (1, Dout), dtype=jnp.float32) * 0.1,
    }

    out = dot_attention_aggregation(x, y, params)
    out = jax.block_until_ready(out)

    ref = _reference(x, y, params)
    assert out.shape == (N, Dout), out.shape
    # Newton-refined reciprocal -> tolerance tightened vs. the previous 2e-3.
    assert jnp.allclose(out, ref, atol=1e-3, rtol=1e-3), \
        float(jnp.max(jnp.abs(out - ref)))

    print("KERNEL_OK")
</pallas_src>

<mosaic_0001>
module attributes {stable_mosaic.version = 11 : i64} {
  func.func @_dot_attn_agg_kernel(%arg0: i32, %arg1: i32, %arg2: memref<8x16xf32, #tpu.memory_space<vmem>>, %arg3: memref<128x16xf32, #tpu.memory_space<vmem>>, %arg4: memref<16x128xf32, #tpu.memory_space<vmem>>, %arg5: memref<1x128xf32, #tpu.memory_space<vmem>>, %arg6: memref<16x128xf32, #tpu.memory_space<vmem>>, %arg7: memref<1x128xf32, #tpu.memory_space<vmem>>, %arg8: memref<16x128xf32, #tpu.memory_space<vmem>>, %arg9: memref<1x128xf32, #tpu.memory_space<vmem>>, %arg10: memref<16x128xf32, #tpu.memory_space<vmem>>, %arg11: memref<1x128xf32, #tpu.memory_space<vmem>>, %arg12: memref<8x128xf32, #tpu.memory_space<vmem>>, %arg13: memref<16x128xf32, #tpu.memory_space<vmem>>, %arg14: memref<1x128xf32, #tpu.memory_space<vmem>>, %arg15: memref<1x128xf32, #tpu.memory_space<vmem>>, %arg16: memref<1x128xf32, #tpu.memory_space<vmem>>) attributes {dimension_semantics = [#tpu.dimension_semantics<arbitrary>, #tpu.dimension_semantics<arbitrary>], iteration_bounds = array<i64: 2, 1>, scalar_prefetch = 0 : i64, scratch_operands = 4 : i64, tpu.core_type = #tpu.core_type<tc>, window_params = [{transform_indices = @transform_0, window_bounds = array<i64: 8, 16>}, {pipeline_mode = #tpu.pipeline_mode<synchronous>, transform_indices = @transform_1, window_bounds = array<i64: 128, 16>}, {pipeline_mode = #tpu.pipeline_mode<synchronous>, transform_indices = @transform_2, window_bounds = array<i64: 16, 128>}, {pipeline_mode = #tpu.pipeline_mode<synchronous>, transform_indices = @transform_3, window_bounds = array<i64: 1, 128>}, {pipeline_mode = #tpu.pipeline_mode<synchronous>, transform_indices = @transform_4, window_bounds = array<i64: 16, 128>}, {pipeline_mode = #tpu.pipeline_mode<synchronous>, transform_indices = @transform_5, window_bounds = array<i64: 1, 128>}, {pipeline_mode = #tpu.pipeline_mode<synchronous>, transform_indices = @transform_6, window_bounds = array<i64: 16, 128>}, {pipeline_mode = #tpu.pipeline_mode<synchronous>, transform_indices = @transform_7, window_bounds = array<i64: 1, 128>}, {pipeline_mode = #tpu.pipeline_mode<synchronous>, transform_indices = @transform_8, window_bounds = array<i64: 16, 128>}, {pipeline_mode = #tpu.pipeline_mode<synchronous>, transform_indices = @transform_9, window_bounds = array<i64: 1, 128>}, {transform_indices = @transform_10, window_bounds = array<i64: 8, 128>}]} {
    %c0 = arith.constant 0 : index
    %c0_0 = arith.constant 0 : index
    %0 = vector.load %arg2[%c0, %c0_0] : memref<8x16xf32, #tpu.memory_space<vmem>>, vector<8x16xf32>
    %c0_i32 = arith.constant 0 : i32
    %1 = arith.cmpi eq, %arg0, %c0_i32 : i32
    %c0_i32_1 = arith.constant 0 : i32
    %2 = arith.cmpi eq, %arg1, %c0_i32_1 : i32
    %3 = arith.andi %1, %2 : i1
    %4 = arith.extui %3 : i1 to i32
    %c0_i32_2 = arith.constant 0 : i32
    %5 = arith.cmpi ne, %4, %c0_i32_2 : i32
    scf.if %5 {
      %c0_9 = arith.constant 0 : index
      %c0_10 = arith.constant 0 : index
      %17 = vector.load %arg3[%c0_9, %c0_10] : memref<128x16xf32, #tpu.memory_space<vmem>>, vector<128x16xf32>
      %c0_11 = arith.constant 0 : index
      %c0_12 = arith.constant 0 : index
      %18 = vector.load %arg6[%c0_11, %c0_12] : memref<16x128xf32, #tpu.memory_space<vmem>>, vector<16x128xf32>
      %cst = arith.constant dense<0.000000e+00> : vector<128x128xf32>
      %19 = tpu.matmul %17, %18, %cst {dimension_numbers = #tpu.dot_dimension_numbers<[1], [0], [0], [1], [0, 0, 1, 1], [], []>} : vector<128x16xf32>, vector<16x128xf32>, vector<128x128xf32> -> vector<128x128xf32>
      %c0_13 = arith.constant 0 : index
      %c0_14 = arith.constant 0 : index
      %20 = vector.load %arg7[%c0_13, %c0_14] : memref<1x128xf32, #tpu.memory_space<vmem>>, vector<1x128xf32>
      %21 = vector.broadcast %20 : vector<1x128xf32> to vector<128x128xf32>
      %22 = arith.addf %19, %21 : vector<128x128xf32>
      %c0_15 = arith.constant 0 : index
      %c0_16 = arith.constant 0 : index
      %23 = vector.load %arg4[%c0_15, %c0_16] : memref<16x128xf32, #tpu.memory_space<vmem>>, vector<16x128xf32>
      %cst_17 = arith.constant dense<0.000000e+00> : vector<16x128xf32>
      %24 = tpu.matmul %23, %22, %cst_17 {dimension_numbers = #tpu.dot_dimension_numbers<[1], [1], [0], [0], [0, 0, 1, 0], [], []>} : vector<16x128xf32>, vector<128x128xf32>, vector<16x128xf32> -> vector<16x128xf32>
      %c0_18 = arith.constant 0 : index
      %c0_19 = arith.constant 0 : index
      %25 = vector.load %arg13[%c0_18, %c0_19] : memref<16x128xf32, #tpu.memory_space<vmem>>, vector<16x128xf32>
      tpu.vector_store %arg13[%c0_18, %c0_19], %24 {strides = array<i32>} : memref<16x128xf32, #tpu.memory_space<vmem>>, vector<16x128xf32>,
      %26 = tpu.iota {dimensions = array<i32: 1>} : vector<1x128xi32>
      %c8_i32 = arith.constant 8 : i32
      %27 = vector.broadcast %c8_i32 : i32 to vector<1x128xi32>
      %28 = arith.cmpi slt, %26, %27 : vector<1x128xi32>
      %cst_20 = arith.constant 0.000000e+00 : f32
      %cst_21 = arith.constant -1.000000e+30 : f32
      %29 = vector.broadcast %cst_20 : f32 to vector<1x128xf32>
      %30 = vector.broadcast %cst_21 : f32 to vector<1x128xf32>
      %31 = arith.select %28, %29, %30 : vector<1x128xi1>, vector<1x128xf32>
      %c0_22 = arith.constant 0 : index
      %c0_23 = arith.constant 0 : index
      %32 = vector.load %arg5[%c0_22, %c0_23] : memref<1x128xf32, #tpu.memory_space<vmem>>, vector<1x128xf32>
      %cst_24 = arith.constant dense<0.000000e+00> : vector<1x128xf32>
      %33 = tpu.matmul %32, %22, %cst_24 {dimension_numbers = #tpu.dot_dimension_numbers<[1], [1], [0], [0], [0, 0, 1, 0], [], []>} : vector<1x128xf32>, vector<128x128xf32>, vector<1x128xf32> -> vector<1x128xf32>
      %34 = arith.addf %33, %31 : vector<1x128xf32>
      %c0_25 = arith.constant 0 : index
      %c0_26 = arith.constant 0 : index
      %35 = vector.load %arg14[%c0_25, %c0_26] : memref<1x128xf32, #tpu.memory_space<vmem>>, vector<1x128xf32>
      tpu.vector_store %arg14[%c0_25, %c0_26], %34 {strides = array<i32>} : memref<1x128xf32, #tpu.memory_space<vmem>>, vector<1x128xf32>,
      %cst_27 = arith.constant 0.000000e+00 : f32
      %36 = vector.broadcast %cst_27 : f32 to vector<1x128xf32>
      %c0_28 = arith.constant 0 : index
      %c0_29 = arith.constant 0 : index
      %37 = vector.load %arg15[%c0_28, %c0_29] : memref<1x128xf32, #tpu.memory_space<vmem>>, vector<1x128xf32>
      tpu.vector_store %arg15[%c0_28, %c0_29], %36 {strides = array<i32>} : memref<1x128xf32, #tpu.memory_space<vmem>>, vector<1x128xf32>,
    } else {
    }
    %c0_i32_3 = arith.constant 0 : i32
    %6 = arith.cmpi eq, %arg0, %c0_i32_3 : i32
    %7 = arith.extui %6 : i1 to i32
    %c0_i32_4 = arith.constant 0 : i32
    %8 = arith.cmpi ne, %7, %c0_i32_4 : i32
    scf.if %8 {
      %c0_9 = arith.constant 0 : index
      %c0_10 = arith.constant 0 : index
      %17 = vector.load %arg13[%c0_9, %c0_10] : memref<16x128xf32, #tpu.memory_space<vmem>>, vector<16x128xf32>
      %cst = arith.constant dense<0.000000e+00> : vector<8x128xf32>
      %18 = tpu.matmul %0, %17, %cst {dimension_numbers = #tpu.dot_dimension_numbers<[1], [0], [0], [1], [0, 0, 1, 1], [], []>} : vector<8x16xf32>, vector<16x128xf32>, vector<8x128xf32> -> vector<8x128xf32>
      %c0_11 = arith.constant 0 : index
      %c0_12 = arith.constant 0 : index
      %19 = vector.load %arg14[%c0_11, %c0_12] : memref<1x128xf32, #tpu.memory_space<vmem>>, vector<1x128xf32>
      %20 = vector.broadcast %19 : vector<1x128xf32> to vector<8x128xf32>
      %21 = arith.addf %18, %20 : vector<8x128xf32>
      %cst_13 = arith.constant dense<0xFF800000> : vector<8xf32>
      %22 = vector.multi_reduction <maximumf>, %21, %cst_13 [1] : vector<8x128xf32> to vector<8xf32>
      %23 = vector.shape_cast %22 : vector<8xf32> to vector<8x1xf32>
      %24 = vector.broadcast %23 : vector<8x1xf32> to vector<8x128xf32>
      %25 = arith.subf %21, %24 : vector<8x128xf32>
      %26 = math.exp %25 : vector<8x128xf32>
      %cst_14 = arith.constant dense<0.000000e+00> : vector<8xf32>
      %27 = vector.multi_reduction <add>, %26, %cst_14 [1] : vector<8x128xf32> to vector<8xf32>
      %28 = vector.shape_cast %27 : vector<8xf32> to vector<8x1xf32>
      %29 = tpu.reciprocal %28 {approx = true} : vector<8x1xf32> -> vector<8x1xf32>
      %30 = arith.mulf %28, %29 : vector<8x1xf32>
      %cst_15 = arith.constant 2.000000e+00 : f32
      %31 = vector.broadcast %cst_15 : f32 to vector<8x1xf32>
      %32 = arith.subf %31, %30 : vector<8x1xf32>
      %33 = arith.mulf %29, %32 : vector<8x1xf32>
      %34 = vector.broadcast %33 : vector<8x1xf32> to vector<8x128xf32>
      %35 = arith.mulf %26, %34 : vector<8x128xf32>
      %c8_i32 = arith.constant 8 : i32
      %36 = arith.muli %arg1, %c8_i32 : i32
      %37 = tpu.iota {dimensions = array<i32: 1>} : vector<1x8xi32>
      %38 = vector.broadcast %36 : i32 to vector<1x8xi32>
      %39 = arith.addi %38, %37 : vector<1x8xi32>
      %c8_i32_16 = arith.constant 8 : i32
      %40 = vector.broadcast %c8_i32_16 : i32 to vector<1x8xi32>
      %41 = arith.cmpi slt, %39, %40 : vector<1x8xi32>
      %42 = arith.extui %41 : vector<1x8xi1> to vector<1x8xi32>
      %43 = arith.sitofp %42 : vector<1x8xi32> to vector<1x8xf32>
      %c0_17 = arith.constant 0 : index
      %c0_18 = arith.constant 0 : index
      %44 = vector.load %arg15[%c0_17, %c0_18] : memref<1x128xf32, #tpu.memory_space<vmem>>, vector<1x128xf32>
      %cst_19 = arith.constant dense<0.000000e+00> : vector<1x128xf32>
      %45 = tpu.matmul %43, %35, %cst_19 {dimension_numbers = #tpu.dot_dimension_numbers<[1], [0], [0], [1], [0, 0, 1, 1], [], []>} : vector<1x8xf32>, vector<8x128xf32>, vector<1x128xf32> -> vector<1x128xf32>
      %46 = arith.addf %44, %45 : vector<1x128xf32>
      %c0_20 = arith.constant 0 : index
      %c0_21 = arith.constant 0 : index
      %47 = vector.load %arg15[%c0_20, %c0_21] : memref<1x128xf32, #tpu.memory_space<vmem>>, vector<1x128xf32>
      tpu.vector_store %arg15[%c0_20, %c0_21], %46 {strides = array<i32>} : memref<1x128xf32, #tpu.memory_space<vmem>>, vector<1x128xf32>,
    } else {
    }
    %c1_i32 = arith.constant 1 : i32
    %9 = arith.cmpi eq, %arg0, %c1_i32 : i32
    %c0_i32_5 = arith.constant 0 : i32
    %10 = arith.cmpi eq, %arg1, %c0_i32_5 : i32
    %11 = arith.andi %9, %10 : i1
    %12 = arith.extui %11 : i1 to i32
    %c0_i32_6 = arith.constant 0 : i32
    %13 = arith.cmpi ne, %12, %c0_i32_6 : i32
    scf.if %13 {
      %c0_9 = arith.constant 0 : index
      %c0_10 = arith.constant 0 : index
      %17 = vector.load %arg15[%c0_9, %c0_10] : memref<1x128xf32, #tpu.memory_space<vmem>>, vector<1x128xf32>
      %c0_11 = arith.constant 0 : index
      %c0_12 = arith.constant 0 : index
      %18 = vector.load %arg3[%c0_11, %c0_12] : memref<128x16xf32, #tpu.memory_space<vmem>>, vector<128x16xf32>
      %cst = arith.constant dense<0.000000e+00> : vector<1x16xf32>
      %19 = tpu.matmul %17, %18, %cst {dimension_numbers = #tpu.dot_dimension_numbers<[1], [0], [0], [1], [0, 0, 1, 1], [], []>} : vector<1x128xf32>, vector<128x16xf32>, vector<1x16xf32> -> vector<1x16xf32>
      %c0_13 = arith.constant 0 : index
      %c0_14 = arith.constant 0 : index
      %20 = vector.load %arg8[%c0_13, %c0_14] : memref<16x128xf32, #tpu.memory_space<vmem>>, vector<16x128xf32>
      %cst_15 = arith.constant dense<0.000000e+00> : vector<1x128xf32>
      %21 = tpu.matmul %19, %20, %cst_15 {dimension_numbers = #tpu.dot_dimension_numbers<[1], [0], [0], [1], [0, 0, 1, 1], [], []>} : vector<1x16xf32>, vector<16x128xf32>, vector<1x128xf32> -> vector<1x128xf32>
      %c0_16 = arith.constant 0 : index
      %c0_17 = arith.constant 0 : index
      %22 = vector.load %arg9[%c0_16, %c0_17] : memref<1x128xf32, #tpu.memory_space<vmem>>, vector<1x128xf32>
      %cst_18 = arith.constant 8.000000e+00 : f32
      %23 = vector.broadcast %cst_18 : f32 to vector<1x128xf32>
      %24 = arith.mulf %23, %22 : vector<1x128xf32>
      %25 = arith.addf %21, %24 : vector<1x128xf32>
      %c0_19 = arith.constant 0 : index
      %c0_20 = arith.constant 0 : index
      %26 = vector.load %arg11[%c0_19, %c0_20] : memref<1x128xf32, #tpu.memory_space<vmem>>, vector<1x128xf32>
      %27 = arith.addf %25, %26 : vector<1x128xf32>
      %c0_21 = arith.constant 0 : index
      %c0_22 = arith.constant 0 : index
      %28 = vector.load %arg16[%c0_21, %c0_22] : memref<1x128xf32, #tpu.memory_space<vmem>>, vector<1x128xf32>
      tpu.vector_store %arg16[%c0_21, %c0_22], %27 {strides = array<i32>} : memref<1x128xf32, #tpu.memory_space<vmem>>, vector<1x128xf32>,
    } else {
    }
    %c1_i32_7 = arith.constant 1 : i32
    %14 = arith.cmpi eq, %arg0, %c1_i32_7 : i32
    %15 = arith.extui %14 : i1 to i32
    %c0_i32_8 = arith.constant 0 : i32
    %16 = arith.cmpi ne, %15, %c0_i32_8 : i32
    scf.if %16 {
      %c0_9 = arith.constant 0 : index
      %c0_10 = arith.constant 0 : index
      %17 = vector.load %arg10[%c0_9, %c0_10] : memref<16x128xf32, #tpu.memory_space<vmem>>, vector<16x128xf32>
      %cst = arith.constant dense<0.000000e+00> : vector<8x128xf32>
      %18 = tpu.matmul %0, %17, %cst {dimension_numbers = #tpu.dot_dimension_numbers<[1], [0], [0], [1], [0, 0, 1, 1], [], []>} : vector<8x16xf32>, vector<16x128xf32>, vector<8x128xf32> -> vector<8x128xf32>
      %c0_11 = arith.constant 0 : index
      %c0_12 = arith.constant 0 : index
      %19 = vector.load %arg16[%c0_11, %c0_12] : memref<1x128xf32, #tpu.memory_space<vmem>>, vector<1x128xf32>
      %20 = vector.broadcast %19 : vector<1x128xf32> to vector<8x128xf32>
      %21 = arith.addf %18, %20 : vector<8x128xf32>
      %c0_13 = arith.constant 0 : index
      %c0_14 = arith.constant 0 : index
      %22 = vector.load %arg12[%c0_13, %c0_14] : memref<8x128xf32, #tpu.memory_space<vmem>>, vector<8x128xf32>
      tpu.vector_store %arg12[%c0_13, %c0_14], %21 {strides = array<i32>} : memref<8x128xf32, #tpu.memory_space<vmem>>, vector<8x128xf32>,
    } else {
    }
    return
  }
  func.func @transform_0(%arg0: i32, %arg1: i32) -> (i32, i32) {
    %c0_i32 = arith.constant 0 : i32
    %c0_i32_0 = arith.constant 0 : i32
    return %arg1, %c0_i32 : i32, i32
  }
  func.func @transform_1(%arg0: i32, %arg1: i32) -> (i32, i32) {
    %c0_i32 = arith.constant 0 : i32
    %c0_i32_0 = arith.constant 0 : i32
    %c0_i32_1 = arith.constant 0 : i32
    return %c0_i32, %c0_i32_0 : i32, i32
  }
  func.func @transform_2(%arg0: i32, %arg1: i32) -> (i32, i32) {
    %c0_i32 = arith.constant 0 : i32
    %c0_i32_0 = arith.constant 0 : i32
    %c0_i32_1 = arith.constant 0 : i32
    return %c0_i32, %c0_i32_0 : i32, i32
  }
  func.func @transform_3(%arg0: i32, %arg1: i32) -> (i32, i32) {
    %c0_i32 = arith.constant 0 : i32
    %c0_i32_0 = arith.constant 0 : i32
    %c0_i32_1 = arith.constant 0 : i32
    return %c0_i32, %c0_i32_0 : i32, i32
  }
  func.func @transform_4(%arg0: i32, %arg1: i32) -> (i32, i32) {
    %c0_i32 = arith.constant 0 : i32
    %c0_i32_0 = arith.constant 0 : i32
    %c0_i32_1 = arith.constant 0 : i32
    return %c0_i32, %c0_i32_0 : i32, i32
  }
  func.func @transform_5(%arg0: i32, %arg1: i32) -> (i32, i32) {
    %c0_i32 = arith.constant 0 : i32
    %c0_i32_0 = arith.constant 0 : i32
    %c0_i32_1 = arith.constant 0 : i32
    return %c0_i32, %c0_i32_0 : i32, i32
  }
  func.func @transform_6(%arg0: i32, %arg1: i32) -> (i32, i32) {
    %c0_i32 = arith.constant 0 : i32
    %c0_i32_0 = arith.constant 0 : i32
    %c0_i32_1 = arith.constant 0 : i32
    return %c0_i32, %c0_i32_0 : i32, i32
  }
  func.func @transform_7(%arg0: i32, %arg1: i32) -> (i32, i32) {
    %c0_i32 = arith.constant 0 : i32
    %c0_i32_0 = arith.constant 0 : i32
    %c0_i32_1 = arith.constant 0 : i32
    return %c0_i32, %c0_i32_0 : i32, i32
  }
  func.func @transform_8(%arg0: i32, %arg1: i32) -> (i32, i32) {
    %c0_i32 = arith.constant 0 : i32
    %c0_i32_0 = arith.constant 0 : i32
    %c0_i32_1 = arith.constant 0 : i32
    return %c0_i32, %c0_i32_0 : i32, i32
  }
  func.func @transform_9(%arg0: i32, %arg1: i32) -> (i32, i32) {
    %c0_i32 = arith.constant 0 : i32
    %c0_i32_0 = arith.constant 0 : i32
    %c0_i32_1 = arith.constant 0 : i32
    return %c0_i32, %c0_i32_0 : i32, i32
  }
  func.func @transform_10(%arg0: i32, %arg1: i32) -> (i32, i32) {
    %0 = arith.muli %arg1, %arg0 : i32
    %c0_i32 = arith.constant 0 : i32
    %c0_i32_0 = arith.constant 0 : i32
    return %0, %c0_i32 : i32, i32
  }
}

</mosaic_0001>

<bundles_post_ra>
// kernel: tpu_custom_call.1
= control target key start
LH: loop header
LB: loop body
LE: loop exit
PB: predicated region body
PF: predicated region fallthrough
CT: control target
= control target key end

     0   :  { %15 = vsyncpa [#allocation7], 0  ;;  %s2053_s0 = inlined_call_operand.vmem [shape: f32[8,16], index: 0, kind: input, shape index: {}]   ;;  %s2054_s1 = inlined_call_operand.vmem [shape: f32[128,16], index: 1, kind: input, shape index: {}]   ;;  %s2055_s2 = inlined_call_operand.vmem [shape: f32[16,128], index: 2, kind: input, shape index: {}]   ;;  %s2056_s3 = inlined_call_operand.vmem [shape: f32[1,128], index: 3, kind: input, shape index: {}]   ;;  %s2057_s4 = inlined_call_operand.vmem [shape: f32[16,128], index: 4, kind: input, shape index: {}]   ;;  %s2058_s5 = inlined_call_operand.vmem [shape: f32[1,128], index: 5, kind: input, shape index: {}]   ;;  %s2059_s6 = inlined_call_operand.vmem [shape: f32[16,128], index: 6, kind: input, shape index: {}]   ;;  %s2060_s7 = inlined_call_operand.vmem [shape: f32[1,128], index: 7, kind: input, shape index: {}]   ;;  %s2061_s8 = inlined_call_operand.vmem [shape: f32[16,128], index: 8, kind: input, shape index: {}]   ;;  %s2062_s9 = inlined_call_operand.vmem [shape: f32[1,128], index: 9, kind: input, shape index: {}]   ;;  %s2063_s10 = inlined_call_operand.hbm [shape: f32[8,128], index: 10, kind: output, shape index: {}]  }
   0x1   :  { %17 = vsyncpa [#allocation7 + $0x1], 0  ;;  %s1828_s13 = smov 0   ;;  %s1830_s14 = smov 0  }
   0x2   :  { %s1832_s15 = smov 0  }
   0x3 LB: > { %s1280_s16 = sadd.s32 4294967295, %s1757_s15   ;;  %s1281_s17 = sadd.s32 4294967294, %s1757_s15   ;;  %s1757_s15 = sphi %s1832_s15, %s23_s15   ;;  %s1753_s14 = sphi %s1830_s14, %s2066_s14   ;;  %s1749_s13 = sphi %s1828_s13, %s2065_s13  }
   0x4   : > { %s35_s18 = sadd.s32 1, %s1753_s14  ;;  %p1284_p0 = scmp.ge.s32.totalorder %s1757_s15, 1 }
   0x5   : > { %p37_p1 = scmp.ge.s32.totalorder %s35_s18, 2  ;;  %p328_p2 = scmp.lt.s32.totalorder %s1757_s15, 3 }
   0x7   : > { %s2068_s18 = smov (%p37_p1, %s35_s18), 0  ;;  %p329_p3 = pnand %p1284_p0, %p328_p2 }
   0x8   : > { %v1853_v0 = vld [vmem:[%s2053_s0] sm:$0xff] (!%p329_p3)  ;;  %p371_p4 = scmp.eq.s32.totalorder (!%p329_p3), %s1749_s13, 0 }
   0x9   : > { %332 = sbr.rel (%p329_p3) target bundleno = 1987 (0x7c3), region = 60 }
  0x10   : > { %376 = sbr.rel (!%p371_p4) target bundleno = 518 (0x206), region = 64  ;;  %v393_v1 = vld [vmem:[%s2057_s4] sm:$0xff] (%p371_p4)  ;;  %v394_v2 = vld [vmem:[%s2057_s4 + $0x8] sm:$0xff] (%p371_p4)  ;;  %vm402_vm0 = vcmask (%p371_p4), 130048   ;;  %v379_v6 = vld [vmem:[%s2054_s1 + $0x10] sm:$0xff] (%p371_p4)  ;;  %v1759_v20 = vmov (%p371_p4), 0.0|0.0  }
  0x11   : > { %v377_v3 = vld [vmem:[%s2054_s1] sm:$0xff] (%p371_p4)  ;;  %v1559_v4 = vpack.c.bf16 (%p371_p4), %v394_v2, %v393_v1  ;;  %v378_v5 = vld [vmem:[%s2054_s1 + $0x8] sm:$0xff] (%p371_p4)  ;;  %v380_v7 = vld [vmem:[%s2054_s1 + $0x18] sm:$0xff] (%p371_p4)  ;;  %vm1760_vm1 = vmmov (%p371_p4), 0   ;;  %v1761_v22 = vmov (%p371_p4), 0.0  }
  0x12   : > { %1404 = vmatprep.mubr.msk.f32.mxu0 (%p371_p4), %vm402_vm0, %v377_v3  ;;  %v381_v8 = vld [vmem:[%s2054_s1 + $0x20] sm:$0xff] (%p371_p4)  ;;  %v382_v9 = vld [vmem:[%s2054_s1 + $0x28] sm:$0xff] (%p371_p4)  ;;  %v383_v10 = vld [vmem:[%s2054_s1 + $0x30] sm:$0xff] (%p371_p4)  ;;  %751 = vst [vmem:[#allocation4] sm:$0x1] (%p371_p4), %v1761_v22  ;;  %v675_v3 = vlaneseq (%p371_p4) }
  0x13   : > { %1560 = vmatprep.subr.bf16.mxu0 (%p371_p4), %v1559_v4  ;;  %v384_v11 = vld [vmem:[%s2054_s1 + $0x38] sm:$0xff] (%p371_p4)  ;;  %v385_v12 = vld [vmem:[%s2054_s1 + $0x40] sm:$0xff] (%p371_p4)  ;;  %v386_v13 = vld [vmem:[%s2054_s1 + $0x48] sm:$0xff] (%p371_p4) }
  0x14   : > { %1562 = vmatpush3.bf16.msra.mxu0 (%p371_p4), %v1559_v4  ;;  %v387_v14 = vld [vmem:[%s2054_s1 + $0x50] sm:$0xff] (%p371_p4)  ;;  %v388_v15 = vld [vmem:[%s2054_s1 + $0x58] sm:$0xff] (%p371_p4)  ;;  %v389_v16 = vld [vmem:[%s2054_s1 + $0x60] sm:$0xff] (%p371_p4)  ;;  %v676_v4 = vand.u32 (%p371_p4), 127, %v675_v3 }
  0x15   : > { %v390_v17 = vld [vmem:[%s2054_s1 + $0x68] sm:$0xff] (%p371_p4)  ;;  %v391_v18 = vld [vmem:[%s2054_s1 + $0x70] sm:$0xff] (%p371_p4)  ;;  %v392_v19 = vld [vmem:[%s2054_s1 + $0x78] sm:$0xff] (%p371_p4)  ;;  %1595 = vmatprep.subr.bf16.mxu0 (%p371_p4), %v1759_v20 }
  0x16   : > { %v596_v21 = vld [vmem:[%s2055_s2] sm:$0xff] (%p371_p4)  ;;  %v597_v2 = vld [vmem:[%s2055_s2 + $0x8] sm:$0xff] (%p371_p4)  ;;  %vm677_vm2 = vcmp.lt.s32.totalorder (%p371_p4), %v676_v4, 8 }
  0x17   : > { %1405 = vmatmul.mubr.msk.f32.vlgmr.msra.gmra.mrb[0].mxu0 %vm402_vm0, %v378_v5  ;;  %1460 = vmatprep.mubr.f32.mxu1 %v596_v21  ;;  %v1286_v23 = vld [vmem:[%s2058_s5] ss:$0 sm:$0xff]  ;;  %v1762_v5 = vmov -1e+30  }
  0x18   : > { %1407 = vmatprep.mubr.msk.f32.mxu0 %vm402_vm0, %v379_v6  ;;  %v679_v1 = vld [vmem:[%s2056_s3] sm:$0x1]  ;;  %v678_v6 = vsel %vm677_vm2, 0.0, %v1762_v5 }
  0x1b   : > { %1408 = vmatmul.mubr.msk.f32.gmra.mrb[2].mxu0 %vm402_vm0, %v380_v7 }
  0x1c   : > { %1410 = vmatprep.mubr.msk.f32.mxu0 %vm402_vm0, %v381_v8 }
  0x1f   : > { %1411 = vmatmul.mubr.msk.f32.gmra.mrb[4].mxu0 %vm402_vm0, %v382_v9 }
  0x20   : > { %1413 = vmatprep.mubr.msk.f32.mxu0 %vm402_vm0, %v383_v10 }
  0x23   : > { %1414 = vmatmul.mubr.msk.f32.gmra.mrb[6].mxu0 %vm402_vm0, %v384_v11 }
  0x24   : > { %1416 = vmatprep.mubr.msk.f32.mxu0 %vm402_vm0, %v385_v12 }
  0x27   : > { %1417 = vmatmul.mubr.msk.f32.gmra.mrb[8].mxu0 %vm402_vm0, %v386_v13 }
  0x28   : > { %1419 = vmatprep.mubr.msk.f32.mxu0 %vm402_vm0, %v387_v14 }
  0x2b   : > { %1420 = vmatmul.mubr.msk.f32.gmra.mrb[10].mxu0 %vm402_vm0, %v388_v15 }
  0x2c   : > { %1422 = vmatprep.mubr.msk.f32.mxu0 %vm402_vm0, %v389_v16 }
  0x2f   : > { %1423 = vmatmul.mubr.msk.f32.gmra.mrb[12].mxu0 %vm402_vm0, %v390_v17 }
  0x30   : > { %1425 = vmatprep.mubr.msk.f32.mxu0 %vm402_vm0, %v391_v18 }
  0x33   : > { %1426 = vmatmul.mubr.msk.f32.gmra.mrb[14].mxu0 %vm402_vm0, %v392_v19 }
  0x34   : > { %1495 = vmatprep.mubr.msk.f32.mxu0 %vm1760_vm1, %v1761_v22 }
  0xea   : > { %v1406_v24 = vpop.f32.mrb[0].mxu0 }
  0xeb   : > { %v523_v25 = vadd.f32 %v1406_v24, %v1286_v23  ;;  %v517_v26 = vpop.f32.mrb[1].mxu0 }
  0xec   : > { %v518_v27 = vadd.f32 %v1286_v23, %v517_v26 }
  0xee   : > { %v1563_v28 = vpack.c.bf16 %v523_v25, %v518_v27  ;;  %v1409_v29 = vpop.f32.mrb[2].mxu0 }
  0xef   : > { %v533_v30 = vadd.f32 %v1409_v29, %v1286_v23  ;;  %v527_v31 = vpop.f32.mrb[3].mxu0 }
  0xf0   : > { %1564 = vmatprep.subr.bf16.mxu1 %v1563_v28  ;;  %1597 = vmatpush3.bf16.xpose.msra.mxu0 %v1563_v28  ;;  %v528_v32 = vadd.f32 %v1286_v23, %v527_v31 }
  0xf1   : > { %1566 = vmatpush3.bf16.xpose.msra.mxu1 %v1563_v28  ;;  %1598 = vmatprep.subr.bf16.mxu0 %v1759_v20 }
  0xf2   : > { %v1567_v33 = vpack.c.bf16 %v533_v30, %v528_v32  ;;  %v1412_v34 = vpop.f32.mrb[4].mxu0 }
  0xf3   : > { %v543_v35 = vadd.f32 %v1412_v34, %v1286_v23  ;;  %v537_v36 = vpop.f32.mrb[5].mxu0 }
  0xf4   : > { %1568 = vmatprep.subr.bf16.mxu1 %v1567_v33  ;;  %v538_v37 = vadd.f32 %v1286_v23, %v537_v36 }
  0xf6   : > { %v1571_v38 = vpack.c.bf16 %v543_v35, %v538_v37  ;;  %v1415_v39 = vpop.f32.mrb[6].mxu0 }
  0xf7   : > { %v553_v40 = vadd.f32 %v1415_v39, %v1286_v23  ;;  %v547_v41 = vpop.f32.mrb[7].mxu0 }
  0xf8   : > { %1600 = vmatpush3.bf16.xpose.msra.mxu0 %v1567_v33  ;;  %v548_v42 = vadd.f32 %v1286_v23, %v547_v41 }
  0xf9   : > { %1570 = vmatpush3.bf16.xpose.msra.mxu1 %v1567_v33  ;;  %1601 = vmatprep.subr.bf16.mxu0 %v1759_v20 }
  0xfa   : > { %1572 = vmatprep.subr.bf16.mxu1 %v1571_v38  ;;  %v1575_v43 = vpack.c.bf16 %v553_v40, %v548_v42  ;;  %v1418_v44 = vpop.f32.mrb[8].mxu0 }
  0xfb   : > { %v563_v45 = vadd.f32 %v1418_v44, %v1286_v23  ;;  %v557_v46 = vpop.f32.mrb[9].mxu0 }
  0xfc   : > { %v558_v47 = vadd.f32 %v1286_v23, %v557_v46 }
  0xfe   : > { %v1579_v48 = vpack.c.bf16 %v563_v45, %v558_v47  ;;  %v1421_v49 = vpop.f32.mrb[10].mxu0 }
  0xff   : > { %v573_v50 = vadd.f32 %v1421_v49, %v1286_v23  ;;  %v567_v51 = vpop.f32.mrb[11].mxu0 }
 0x100   : > { %1603 = vmatpush3.bf16.xpose.msra.mxu0 %v1571_v38  ;;  %v568_v52 = vadd.f32 %v1286_v23, %v567_v51 }
 0x101   : > { %1574 = vmatpush3.bf16.xpose.msra.mxu1 %v1571_v38  ;;  %1604 = vmatprep.subr.bf16.mxu0 %v1759_v20 }
 0x102   : > { %1576 = vmatprep.subr.bf16.mxu1 %v1575_v43  ;;  %v1583_v53 = vpack.c.bf16 %v573_v50, %v568_v52  ;;  %v1424_v54 = vpop.f32.mrb[12].mxu0 }
 0x103   : > { %v583_v55 = vadd.f32 %v1424_v54, %v1286_v23  ;;  %v577_v56 = vpop.f32.mrb[13].mxu0 }
 0x104   : > { %v578_v57 = vadd.f32 %v1286_v23, %v577_v56 }
 0x106   : > { %v1587_v58 = vpack.c.bf16 %v583_v55, %v578_v57  ;;  %v1427_v59 = vpop.f32.mrb[14].mxu0 }
 0x107   : > { %v593_v60 = vadd.f32 %v1427_v59, %v1286_v23  ;;  %v587_v61 = vpop.f32.mrb[15].mxu0 }
 0x108   : > { %1606 = vmatpush3.bf16.xpose.msra.mxu0 %v1575_v43  ;;  %v588_v62 = vadd.f32 %v1286_v23, %v587_v61 }
 0x109   : > { %1578 = vmatpush3.bf16.xpose.msra.mxu1 %v1575_v43  ;;  %1607 = vmatprep.subr.bf16.mxu0 %v1759_v20 }
 0x10a   : > { %1580 = vmatprep.subr.bf16.mxu1 %v1579_v48  ;;  %v1591_v63 = vpack.c.bf16 %v593_v60, %v588_v62 }
 0x110   : > { %1609 = vmatpush3.bf16.xpose.msra.mxu0 %v1579_v48 }
 0x111   : > { %1582 = vmatpush3.bf16.xpose.msra.mxu1 %v1579_v48  ;;  %1610 = vmatprep.subr.bf16.mxu0 %v1759_v20 }
 0x112   : > { %1584 = vmatprep.subr.bf16.mxu1 %v1583_v53 }
 0x118   : > { %1612 = vmatpush3.bf16.xpose.msra.mxu0 %v1583_v53 }
 0x119   : > { %1586 = vmatpush3.bf16.xpose.msra.mxu1 %v1583_v53  ;;  %1613 = vmatprep.subr.bf16.mxu0 %v1759_v20 }
 0x11a   : > { %1588 = vmatprep.subr.bf16.mxu1 %v1587_v58 }
 0x120   : > { %1615 = vmatpush3.bf16.xpose.msra.mxu0 %v1587_v58 }
 0x121   : > { %1590 = vmatpush3.bf16.xpose.msra.mxu1 %v1587_v58  ;;  %1616 = vmatprep.subr.bf16.mxu0 %v1759_v20 }
 0x122   : > { %1592 = vmatprep.subr.bf16.mxu1 %v1591_v63 }
 0x128   : > { %1618 = vmatpush3.bf16.xpose.msra.mxu0 %v1591_v63 }
 0x129   : > { %1594 = vmatpush3.bf16.xpose.msra.mxu1 %v1591_v63 }
 0x12f   : > { %1496 = vmatmul.mubr.f32.vlgmr.msra.gmra.mrb[16].mxu0 %v679_v1 }
 0x130   : > { %1461 = vmatmul.mubr.f32.vlgmr.msra.gmra.mrb[0].mxu1 %v597_v2 }
 0x202   : > { %v746_v7 = vpop.f32.mrb[16].mxu0 }
 0x203   : > { %v747_v8 = vadd.f32 %v746_v7, %v678_v6  ;;  %v1462_v9 = vpop.f32.mrb[0].mxu1  ;;  %v1497_v10 = vpop.f32.mrb[17].mxu0 }
 0x204   : > { %674 = vst [vmem:[#allocation2 + $0x8] sm:$0xff] %v1462_v9  ;;  %v664_v11 = vpop.f32.mrb[1].mxu1 }
 0x205   : > { %750 = vst [vmem:[#allocation3] sm:$0x1] %v747_v8  ;;  %673 = vst [vmem:[#allocation2] sm:$0xff] %v664_v11 }
 0x206 PF: > { %p1303_p5 = scmp.ne.s32.totalorder %s1749_s13, 0 }
 0x207   : > { %v1763_v14 = vmov (!%p1303_p5), 0.0|0.0   ;;  %vm1764_vm3 = vmmov (!%p1303_p5), 0   ;;  %v1765_v16 = vmov (!%p1303_p5), 0.0   ;;  %vm764_vm4 = vcmask (!%p1303_p5), 130048  }
 0x208   : > { %754 = sbr.rel (%p1303_p5) target bundleno = 1278 (0x4fe), region = 68  ;;  %1619 = vmatprep.subr.bf16.mxu0 (!%p1303_p5), %v1763_v14  ;;  %1502 = vmatprep.mubr.msk.f32.mxu0 (!%p1303_p5), %vm1764_vm3, %v1765_v16  ;;  %v851_v26 = vlaneseq (!%p1303_p5)  ;;  %vm859_vm6 = vcmask (!%p1303_p5), 64512   ;;  %v858_v34 = vld [vmem:[#allocation4] sm:$0x1] (!%p1303_p5) }
 0x209   : > { %1505 = vmatprep.subr.mxu1 (!%p1303_p5), %v1765_v16  ;;  %1507 = vmatprep.mubr.msk.f32.mxu1 (!%p1303_p5), %vm1764_vm3, %v1765_v16 }
 0x20a   : > { %v852_v28 = vand.u32 (!%p1303_p5), 127, %v851_v26 }
 0x20b   : > { %v756_v13 = vld [vmem:[#allocation2 + $0x8] sm:$0xff] (!%p1303_p5) }
 0x20c   : > { %v755_v12 = vld [vmem:[#allocation2] sm:$0xff] (!%p1303_p5)  ;;  %v1304_v17 = vld [vmem:[#allocation3] ss:$0 sm:$0xff] (!%p1303_p5)  ;;  %vm855_vm5 = vcmp.lt.s32.totalorder (!%p1303_p5), %v852_v28, 8 }
 0x20d   : > { %v1620_v15 = vpack.c.bf16 (!%p1303_p5), %v756_v13, %v755_v12  ;;  %v1306_v33 = vsel (!%p1303_p5), %vm855_vm5, 1.0, %v1765_v16 }
 0x20f   : > { %1621 = vmatpush3.bf16.msra.mxu0 %v1620_v15 }
 0x212   : > { %1503 = vmatmul.mubr.msk.f32.vlgmr.msra.gmra.mrb[0].mxu0 %vm764_vm4, %v1853_v0 }
 0x2e5   : > { %v834_v18 = vpop.f32.mrb[0].mxu0 }
 0x2e6   : > { %v835_v19 = vadd.f32 %v1304_v17, %v834_v18  ;;  %v1504_v20 = vpop.f32.mrb[1].mxu0 }
 0x2e8   : > { %838 = vmax.xlane.f32.xlu0 %v835_v19 }
 0x375   : > { %v839_v21 = vpop.xlane.xlu0 %838 }
 0x376   : > { %v840_v22 = vsub.f32 %v835_v19, %v839_v21 }
 0x378   : > { %v841_v23 = vmul.f32 1.442695, %v840_v22 }
 0x37a   : > { %1701 = vpow2.f32 %v841_v23 }
 0x384   : > { %v1702_v24 = vpop.eup %1701 }
 0x385   : > { %843 = vadd.xlane.f32.xlu0 %v1702_v24 }
 0x412   : > { %v844_v25 = vpop.xlane.xlu0 %843 }
 0x413   : > { %1703 = vrcp.f32 %v844_v25 }
 0x41d   : > { %v1704_v27 = vpop.eup %1703 }
 0x41e   : > { %v846_v29 = vmul.f32 %v1704_v27, %v844_v25 }
 0x420   : > { %v847_v30 = vsub.f32 2.0, %v846_v29 }
 0x422   : > { %v848_v31 = vmul.f32 %v1704_v27, %v847_v30 }
 0x424   : > { %v849_v32 = vmul.f32 %v1702_v24, %v848_v31 }
 0x426   : > { %1506 = vmatpush3.msra.mxu1 %v849_v32 }
 0x427   : > { %1508 = vmatmul.mubr.msk.f32.vlgmr.msra.gmra.mrb[0].mxu1 %vm859_vm6, %v1306_v33 }
 0x4fa   : > { %v929_v35 = vpop.f32.mrb[0].mxu1 }
 0x4fb   : > { %v933_v36 = vadd.f32 %v929_v35, %v858_v34  ;;  %v1509_v37 = vpop.f32.mrb[1].mxu1 }
 0x4fd   : > { %934 = vst [vmem:[#allocation4] sm:$0x1] %v933_v36 }
 0x4fe PF: > { %p935_p6 = scmp.eq.s32.totalorder %s1749_s13, 1 }
 0x4ff   : > { %v941_v38 = vld [vmem:[%s2054_s1] sm:$0xff] (%p935_p6)  ;;  %v942_v39 = vld [vmem:[%s2054_s1 + $0x8] sm:$0xff] (%p935_p6)  ;;  %v943_v40 = vld [vmem:[%s2054_s1 + $0x10] sm:$0xff] (%p935_p6)  ;;  %v1766_v41 = vmov (%p935_p6), 0.0|0.0   ;;  %vm1767_vm7 = vmmov (%p935_p6), 0   ;;  %v1768_v44 = vmov (%p935_p6), 0.0  }
 0x500   : > { %939 = sbr.rel (!%p935_p6) target bundleno = 1742 (0x6ce), region = 72  ;;  %1622 = vmatprep.subr.bf16.mxu0 (%p935_p6), %v1766_v41  ;;  %v1623_v42 = vpack.c.bf16 (%p935_p6), %v942_v39, %v941_v38  ;;  %v944_v43 = vld [vmem:[%s2054_s1 + $0x18] sm:$0xff] (%p935_p6)  ;;  %1542 = vmatprep.mubr.msk.f32.mxu0 (%p935_p6), %vm1767_vm7, %v1768_v44  ;;  %v945_v46 = vld [vmem:[%s2054_s1 + $0x20] sm:$0xff] (%p935_p6)  ;;  %v946_v47 = vld [vmem:[%s2054_s1 + $0x28] sm:$0xff] (%p935_p6)  ;;  %vm1031_vm8 = vcmask (%p935_p6), 130048  }
 0x501   : > { %1646 = vmatprep.subr.bf16.mxu1 (%p935_p6), %v1766_v41  ;;  %1549 = vmatprep.mubr.msk.f32.mxu1 (%p935_p6), %vm1767_vm7, %v1768_v44  ;;  %v1626_v45 = vpack.c.bf16 (%p935_p6), %v944_v43, %v943_v40  ;;  %v1027_v48 = vld [vmem:[%s2059_s6] sm:$0xff] (%p935_p6)  ;;  %v1028_v49 = vld [vmem:[%s2059_s6 + $0x8] sm:$0xff] (%p935_p6)  ;;  %v1629_v50 = vpack.c.bf16 (%p935_p6), %v946_v47, %v945_v46  ;;  %v947_v52 = vld [vmem:[%s2054_s1 + $0x30] sm:$0xff] (%p935_p6) }
 0x502   : > { %1624 = vmatpush3.bf16.msra.mxu0 (%p935_p6), %v1623_v42  ;;  %v1647_v51 = vpack.c.bf16 (%p935_p6), %v1028_v49, %v1027_v48  ;;  %v948_v53 = vld [vmem:[%s2054_s1 + $0x38] sm:$0xff] (%p935_p6)  ;;  %v949_v55 = vld [vmem:[%s2054_s1 + $0x40] sm:$0xff] (%p935_p6)  ;;  %v950_v56 = vld [vmem:[%s2054_s1 + $0x48] sm:$0xff] (%p935_p6) }
 0x503   : > { %1625 = vmatprep.subr.bf16.mxu0 (%p935_p6), %v1766_v41  ;;  %v1632_v54 = vpack.c.bf16 (%p935_p6), %v948_v53, %v947_v52  ;;  %v1635_v57 = vpack.c.bf16 (%p935_p6), %v950_v56, %v949_v55  ;;  %v951_v58 = vld [vmem:[%s2054_s1 + $0x50] sm:$0xff] (%p935_p6)  ;;  %v952_v59 = vld [vmem:[%s2054_s1 + $0x58] sm:$0xff] (%p935_p6)  ;;  %v953_v61 = vld [vmem:[%s2054_s1 + $0x60] sm:$0xff] (%p935_p6) }
 0x504   : > { %1648 = vmatpush3.bf16.msra.mxu1 (%p935_p6), %v1647_v51  ;;  %v1638_v60 = vpack.c.bf16 (%p935_p6), %v952_v59, %v951_v58  ;;  %v954_v62 = vld [vmem:[%s2054_s1 + $0x68] sm:$0xff] (%p935_p6)  ;;  %v955_v1 = vld [vmem:[%s2054_s1 + $0x70] sm:$0xff] (%p935_p6)  ;;  %v956_v2 = vld [vmem:[%s2054_s1 + $0x78] sm:$0xff] (%p935_p6) }
 0x505   : > { %v1641_v63 = vpack.c.bf16 (%p935_p6), %v954_v62, %v953_v61  ;;  %v1644_v3 = vpack.c.bf16 (%p935_p6), %v956_v2, %v955_v1  ;;  %v940_v4 = vld [vmem:[#allocation4] sm:$0x1] (%p935_p6)  ;;  %v1029_v7 = vld [vmem:[%s2060_s7] sm:$0x1] (%p935_p6) }
 0x506   : > { %1627 = vmatpush3.bf16.msra.mxu0 (%p935_p6), %v1626_v45  ;;  %v1030_v8 = vmul.f32 (%p935_p6), 8.0, %v1029_v7  ;;  %v1105_v10 = vld [vmem:[%s2062_s9] sm:$0x1] (%p935_p6) }
 0x507   : > { %1628 = vmatprep.subr.bf16.mxu0 %v1766_v41 }
 0x50a   : > { %1630 = vmatpush3.bf16.msra.mxu0 %v1629_v50 }
 0x50b   : > { %1631 = vmatprep.subr.bf16.mxu0 %v1766_v41 }
 0x50e   : > { %1633 = vmatpush3.bf16.msra.mxu0 %v1632_v54 }
 0x50f   : > { %1634 = vmatprep.subr.bf16.mxu0 %v1766_v41 }
 0x512   : > { %1636 = vmatpush3.bf16.msra.mxu0 %v1635_v57 }
 0x513   : > { %1637 = vmatprep.subr.bf16.mxu0 %v1766_v41 }
 0x516   : > { %1639 = vmatpush3.bf16.msra.mxu0 %v1638_v60 }
 0x517   : > { %1640 = vmatprep.subr.bf16.mxu0 %v1766_v41 }
 0x51a   : > { %1642 = vmatpush3.bf16.msra.mxu0 %v1641_v63 }
 0x51b   : > { %1643 = vmatprep.subr.bf16.mxu0 %v1766_v41 }
 0x51e   : > { %1645 = vmatpush3.bf16.msra.mxu0 %v1644_v3 }
 0x521   : > { %1543 = vmatmul.mubr.f32.vlgmr.msra.gmra.mrb[0].mxu0 %v940_v4 }
 0x5f4   : > { %v1023_v5 = vpop.f32.mrb[0].mxu0 }
 0x5f5   : > { %v1544_v6 = vpop.f32.mrb[1].mxu0  ;;  %1550 = vmatmul.mubr.msk.f32.vlgmr.msra.gmra.mrb[0].mxu1 %vm1031_vm8, %v1023_v5 }
 0x6c8   : > { %v1101_v9 = vpop.f32.mrb[0].mxu1 }
 0x6c9   : > { %v1102_v11 = vadd.f32 %v1101_v9, %v1030_v8  ;;  %v1551_v12 = vpop.f32.mrb[1].mxu1 }
 0x6cb   : > { %v1106_v13 = vadd.f32 %v1105_v10, %v1102_v11 }
 0x6cd   : > { %1107 = vst [vmem:[#allocation5] sm:$0x1] %v1106_v13 }
 0x6ce PF: > { %p1310_p7 = scmp.ne.s32.totalorder %s1749_s13, 1 }
 0x6cf   : > { %v1111_v14 = vld [vmem:[%s2061_s8] sm:$0xff] (!%p1310_p7)  ;;  %v1112_v15 = vld [vmem:[%s2061_s8 + $0x8] sm:$0xff] (!%p1310_p7)  ;;  %v1769_v16 = vmov (!%p1310_p7), 0.0|0.0   ;;  %vm1770_vm9 = vmmov (!%p1310_p7), 0   ;;  %v1771_v18 = vmov (!%p1310_p7), 0.0   ;;  %vm1120_vm10 = vcmask (!%p1310_p7), 130048  }
 0x6d0   : > { %1110 = sbr.rel (%p1310_p7) target bundleno = 1964 (0x7ac), region = 76  ;;  %1649 = vmatprep.subr.bf16.mxu0 (!%p1310_p7), %v1769_v16  ;;  %v1650_v17 = vpack.c.bf16 (!%p1310_p7), %v1112_v15, %v1111_v14  ;;  %1556 = vmatprep.mubr.msk.f32.mxu0 (!%p1310_p7), %vm1770_vm9, %v1771_v18 }
 0x6d2   : > { %1651 = vmatpush3.bf16.msra.mxu0 (!%p1310_p7), %v1650_v17 }
 0x6d4   : > { %v1311_v19 = vld [vmem:[#allocation5] ss:$0 sm:$0xff] (!%p1310_p7) }
 0x6d5   : > { %1557 = vmatmul.mubr.msk.f32.vlgmr.msra.gmra.mrb[0].mxu0 (!%p1310_p7), %vm1120_vm10, %v1853_v0 }
 0x7a8   : > { %v1190_v20 = vpop.f32.mrb[0].mxu0 }
 0x7a9   : > { %v1191_v21 = vadd.f32 %v1311_v19, %v1190_v20  ;;  %v1558_v22 = vpop.f32.mrb[1].mxu0 }
 0x7ab   : > { %1194 = vst [vmem:[#allocation6] sm:$0xff] %v1191_v21 }
 0x7ac PF: > { %p2019_p8 = scmp.eq.s32.totalorder %s1280_s16, 1  ;;  %s1772_s25 = smov [#allocation6]  }
 0x7ad   : > { %s1210_s26 = sshll.u32 %s1772_s25, 4  ;;  %s1211_s26 = int_to_ptr.vmem [resolvable:$true] %s1210_s26 }
 0x7ae   : > { %s1705_s27 = scalar_lea.vmem %s1211_s26, 128  ;;  %s1711_s28 = scalar_lea.vmem %s1211_s26, 256 }
 0x7af   : > { %p1706_p9 = scmp.ne.s32.totalorder %s1211_s26, %s1705_s27  ;;  %p1712_p12 = scmp.lt.s32.totalorder %s1211_s26, %s1211_s26 }
 0x7b0   : > { %p1713_p13 = scmp.lt.s32.totalorder %s1711_s28, %s1705_s27 }
 0x7b1   : > { %p1707_p10 = pnand %p1706_p9, %p2019_p8 }
 0x7b2   : > { %p1714_p0 = por %p1713_p13, %p1712_p12 }
 0x7b3   : > { %p1708_p11 = pneg %p1707_p10 }
 0x7b5   : > { %p1715_p1 = pnand %p1714_p0, %p1708_p11 }
 0x7b7   : > { %1718 = shalt.err (!%p1715_p1)
}
 0x7b8   : > { %s1719_s30 = scalar_lea.hbm %s2063_s10, 128 }
 0x7b9   : > { %p1720_p2 = scmp.ne.s32.totalorder %s2063_s10, %s1719_s30  ;;  %p1725_p5 = scmp.lt.u32.totalorder %s1719_s30, %s2063_s10 }
 0x7bb   : > { %p1721_p3 = pnand %p1720_p2, %p2019_p8 }
 0x7bd   : > { %p1722_p4 = pneg %p1721_p3 }
 0x7bf   : > { %p1727_p6 = pnand %p1725_p5, %p1722_p4 }
 0x7c1   : > { %1730 = shalt.err (!%p1727_p6)
}
 0x7c2   : > { %1653 = dma.vmem_to_hbm [thread:$0]  (%p2019_p8), %s1211_s26, 128, %s2063_s10, [#allocation7]  }
 0x7c3 PF: > { %p1661_p7 = scmp.ge.s32.totalorder %s1757_s15, 2  ;;  %p1662_p9 = scmp.eq.s32.totalorder %s1281_s17, 1 }
 0x7c5   : > { %p1657_p10 = pnand %p1662_p9, %p1661_p7 }
 0x7c7   : > { %1744 = dma.done.wait (!%p1657_p10), [#allocation7], 128  }
 0x7c8   : > { %1746 = vsyncadd (!%p1657_p10), [#allocation7], 4294967168  ;;  %s23_s15 = sadd.s32 1, %s1757_s15   ;;  %s2065_s13 = smov %s1753_s14 }
 0x7c9   : > { %p20_p11 = scmp.ge.s32.totalorder %s23_s15, 4   ;;  %s2066_s14 = smov %s2068_s18 }
 0x7cb   :  { %22 = sbr.rel (!%p20_p11) target bundleno = 3 (0x3), region = 111 }
 0x7d2   :  { %1228 = vsyncpa [#allocation7], 1 }
 0x7d3   :  { %1230 = vsyncpa [#allocation7 + $0x1], 1 }

</bundles_post_ra>
